<compile_context>
chip_gen: v5e
topology: v5e:2x2
jax: 0.10.0
libtpu: 0.0.40
codegen_flags: <defaults>
</compile_context>

<pallas_src>
import functools

import jax
import jax.numpy as jnp
from jax.experimental import pallas as pl
from jax.experimental.pallas import tpu as pltpu

_THRESH = 0.5  # deterministic mask threshold (stand-in for the dfl_full fill test)


def _round_up(x, m):
    return (x + m - 1) // m * m


# ---------------------------------------------------------------------------
# Kernel 1 (primary): whole image rows per block, flat (B, C*HW) layout.
# ---------------------------------------------------------------------------
def _flat_kernel(w_ref, x_ref, o_ref, *, hw, thresh):
    """w_ref: (C,) f32 in SMEM; x_ref: (tb, C*HW) native dtype; o_ref: (tb,128) i32."""
    C = w_ref.shape[0]
    # Unrolled SMEM-scalar * lane-vector accumulate; channel c is a contiguous
    # (128-aligned when HW % 128 == 0) lane slice of the flat row.
    heat = x_ref[:, pl.ds(0, hw)].astype(jnp.float32) * w_ref[0]
    for c in range(1, C):
        heat = heat + x_ref[:, pl.ds(c * hw, hw)].astype(jnp.float32) * w_ref[c]
    # "mask.getbbox() non-empty"  <=>  any pixel above threshold
    #                             <=>  lane-max above threshold (XLU reduce).
    flag = (jnp.max(heat, axis=-1, keepdims=True) > thresh).astype(jnp.int32)
    o_ref[...] = jnp.broadcast_to(flag, o_ref.shape)


# ---------------------------------------------------------------------------
# Kernel 2 (fallback): HW-chunked, for images too large for whole-row blocks.
# Running lane-max accumulator over the "arbitrary" HW-chunk grid axis.
# ---------------------------------------------------------------------------
def _chunked_kernel(w_ref, x_ref, o_ref, m_sc, *, hw_total, thw, thresh):
    """x_ref: (tb, C, thw); m_sc: (tb, 1) f32 VMEM scratch; o_ref: (tb, 128) i32."""
    j = pl.program_id(1)

    @pl.when(j == 0)
    def _():
        m_sc[...] = jnp.full_like(m_sc, -jnp.inf)

    C = x_ref.shape[1]
    heat = x_ref[:, 0, :].astype(jnp.float32) * w_ref[0]
    for c in range(1, C):
        heat = heat + x_ref[:, c, :].astype(jnp.float32) * w_ref[c]

    if hw_total % thw != 0:
        # Ragged last chunk: ignore lanes past the valid pixel count.
        valid = hw_total - j * thw
        lane = jax.lax.broadcasted_iota(jnp.int32, heat.shape, 1)
        heat = jnp.where(lane < valid, heat, -jnp.inf)

    m_sc[...] = jnp.maximum(m_sc[...], jnp.max(heat, axis=-1, keepdims=True))

    @pl.when(j == pl.num_programs(1) - 1)
    def _():
        flag = (m_sc[...] > thresh).astype(jnp.int32)
        o_ref[...] = jnp.broadcast_to(flag, o_ref.shape)


def model_out_forward(x_nchw, w_c, *, vmem_budget_bytes=None):
    """Returns an int32 vector of shape (B,) with 0/1 per image, mirroring the
    Python list of ints returned by ModelOut.forward."""
    B, C, H, W = x_nchw.shape
    HW = H * W
    itemsize = jnp.dtype(x_nchw.dtype).itemsize

    # ---- VMEM accounting (per-generation, queried at trace time) -----------
    try:
        phys = int(getattr(pltpu.get_tpu_info(), "vmem_capacity_bytes", 64 << 20))
    except Exception:  # conservative default (v7x-sized VMEM)
        phys = 64 << 20
    # Scoped limit requested from the compiler: headroom under physical,
    # never below the usual 32 MiB default, capped at ~100 MiB (v5e/v6e).
    vmem_limit = int(min(max(phys - (8 << 20), 32 << 20), 100 << 20))
    # Tiling budget (overridable so tests can force the HW-chunked path).
    budget = int(vmem_budget_bytes) if vmem_budget_bytes is not None else vmem_limit
    in_budget = max(1, (budget * 4) // 5)  # ~20% slack for outputs / misc scratch

    w = w_c.reshape(C).astype(jnp.float32)
    row_bytes = C * HW * itemsize            # one image, native dtype
    tb_min = B if B <= 8 else 8
    use_flat = 2 * tb_min * row_bytes <= in_budget   # double-buffered input block

    if use_flat:
        # Free reshape (NCHW is row-major contiguous): channels contiguous per
        # image, tiny C axis never lands on the sublane dimension.
        x = x_nchw.reshape(B, C * HW)
        if B <= 8:
            tb = B                           # block dim == full array dim is legal
        else:
            cap = max(8, ((in_budget // (2 * row_bytes)) // 8) * 8)
            tb = min(cap, 256, _round_up(B, 8))
            if 2 * tb > B:                   # keep >= 2 grid steps (v7x megacore)
                tb = min(tb, max(8, _round_up((B + 1) // 2, 8)))
            if B % tb != 0:                  # prefer an exact divisor of B
                for cand in range(tb, 7, -8):
                    if B % cand == 0:
                        tb = cand
                        break
        grid = (pl.cdiv(B, tb),)
        kernel = functools.partial(_flat_kernel, hw=HW, thresh=_THRESH)
        in_specs = [pl.BlockSpec((tb, C * HW), lambda i, w_ref: (i, 0))]
        out_specs = pl.BlockSpec((tb, 128), lambda i, w_ref: (i, 0))
        scratch_shapes = ()
        dims = ("parallel",)
    else:
        # Images too large for whole-row blocks: tile HW and keep a running
        # lane-max accumulator across chunks (init/finalize via pl.when).
        x = x_nchw.reshape(B, C, HW)
        tb = B if B <= 8 else 8
        c_pad = _round_up(C, 8)              # C sits on the sublane axis here
        lane_bytes = 2 * tb * c_pad * itemsize   # per output lane, double-buffered
        thw = max(128, ((in_budget // lane_bytes) // 128) * 128)
        if thw >= HW:
            thw = HW                         # full-extent block is always legal
        grid = (pl.cdiv(B, tb), pl.cdiv(HW, thw))
        kernel = functools.partial(
            _chunked_kernel, hw_total=HW, thw=thw, thresh=_THRESH)
        in_specs = [pl.BlockSpec((tb, C, thw), lambda i, j, w_ref: (i, 0, j))]
        out_specs = pl.BlockSpec((tb, 128), lambda i, j, w_ref: (i, 0))
        scratch_shapes = (pltpu.VMEM((tb, 1), jnp.float32),)
        dims = ("parallel", "arbitrary")

    cost = pl.CostEstimate(
        flops=int(2 * B * C * HW),
        transcendentals=0,
        bytes_accessed=int(B * C * HW * itemsize + B * 128 * 4),
    )

    out = pl.pallas_call(
        kernel,
        out_shape=jax.ShapeDtypeStruct((B, 128), jnp.int32),
        grid_spec=pltpu.PrefetchScalarGridSpec(
            num_scalar_prefetch=1,           # w -> SMEM, read as scalars
            grid=grid,
            in_specs=in_specs,
            out_specs=out_specs,
            scratch_shapes=scratch_shapes,
        ),
        compiler_params=pltpu.CompilerParams(
            dimension_semantics=dims,
            vmem_limit_bytes=vmem_limit,
        ),
        cost_estimate=cost,
    )(w, x)
    # Flag replicated across the 128 lanes of each image's row; take lane 0.
    return out[:, 0]


def _reference(x_nchw, w_c, thresh=_THRESH):
    B = x_nchw.shape[0]
    heat = jnp.einsum("bchw,c->bhw", x_nchw.astype(jnp.float32),
                      w_c.astype(jnp.float32))
    return (jnp.max(heat.reshape(B, -1), axis=-1) > thresh).astype(jnp.int32)


if __name__ == "__main__":
    key = jax.random.PRNGKey(0)
    B, C, H, W = 2, 4, 16, 16
    x = jax.random.uniform(key, (B, C, H, W), dtype=jnp.float32)

    # Deterministic "landmark head" weights (shape implied by input channels).
    w = (jnp.arange(C, dtype=jnp.float32) + 1.0) / jnp.float32(C)

    expected = _reference(x, w)

    # Primary (flat, whole-row) path.
    results = jax.block_until_ready(model_out_forward(x, w))
    assert results.shape == (B,)
    assert results.dtype == jnp.int32
    assert bool(jnp.array_equal(results, expected))

    # Also exercise the HW-chunked fallback path (forced tiny tiling budget).
    results_chunked = jax.block_until_ready(
        model_out_forward(x, w, vmem_budget_bytes=16 << 10))
    assert bool(jnp.array_equal(results_chunked, expected))

    print("KERNEL_OK")
</pallas_src>

<mosaic_0001>
module attributes {stable_mosaic.version = 11 : i64} {
  func.func @_flat_kernel(%arg0: i32, %arg1: memref<4xf32, #tpu.memory_space<smem>>, %arg2: memref<2x1024xf32, #tpu.memory_space<vmem>>, %arg3: memref<2x128xi32, #tpu.memory_space<vmem>>) attributes {dimension_semantics = [#tpu.dimension_semantics<parallel>], iteration_bounds = array<i64: 1>, scalar_prefetch = 1 : i64, scratch_operands = 0 : i64, tpu.core_type = #tpu.core_type<tc>, window_params = [{transform_indices = @transform_0, window_bounds = array<i64: 2, 1024>}, {transform_indices = @transform_1, window_bounds = array<i64: 2, 128>}]} {
    %c0 = arith.constant 0 : index
    %c0_0 = arith.constant 0 : index
    %0 = vector.load %arg2[%c0, %c0_0] : memref<2x1024xf32, #tpu.memory_space<vmem>>, vector<2x256xf32>
    %c0_1 = arith.constant 0 : index
    %1 = memref.load %arg1[%c0_1] : memref<4xf32, #tpu.memory_space<smem>>
    %2 = vector.broadcast %1 : f32 to vector<2x256xf32>
    %3 = arith.mulf %0, %2 : vector<2x256xf32>
    %c0_2 = arith.constant 0 : index
    %c256 = arith.constant 256 : index
    %4 = vector.load %arg2[%c0_2, %c256] : memref<2x1024xf32, #tpu.memory_space<vmem>>, vector<2x256xf32>
    %c1 = arith.constant 1 : index
    %5 = memref.load %arg1[%c1] : memref<4xf32, #tpu.memory_space<smem>>
    %6 = vector.broadcast %5 : f32 to vector<2x256xf32>
    %7 = arith.mulf %4, %6 : vector<2x256xf32>
    %8 = arith.addf %3, %7 : vector<2x256xf32>
    %c0_3 = arith.constant 0 : index
    %c512 = arith.constant 512 : index
    %9 = vector.load %arg2[%c0_3, %c512] : memref<2x1024xf32, #tpu.memory_space<vmem>>, vector<2x256xf32>
    %c2 = arith.constant 2 : index
    %10 = memref.load %arg1[%c2] : memref<4xf32, #tpu.memory_space<smem>>
    %11 = vector.broadcast %10 : f32 to vector<2x256xf32>
    %12 = arith.mulf %9, %11 : vector<2x256xf32>
    %13 = arith.addf %8, %12 : vector<2x256xf32>
    %c0_4 = arith.constant 0 : index
    %c768 = arith.constant 768 : index
    %14 = vector.load %arg2[%c0_4, %c768] : memref<2x1024xf32, #tpu.memory_space<vmem>>, vector<2x256xf32>
    %c3 = arith.constant 3 : index
    %15 = memref.load %arg1[%c3] : memref<4xf32, #tpu.memory_space<smem>>
    %16 = vector.broadcast %15 : f32 to vector<2x256xf32>
    %17 = arith.mulf %14, %16 : vector<2x256xf32>
    %18 = arith.addf %13, %17 : vector<2x256xf32>
    %cst = arith.constant dense<0xFF800000> : vector<2xf32>
    %19 = vector.multi_reduction <maximumf>, %18, %cst [1] : vector<2x256xf32> to vector<2xf32>
    %20 = vector.shape_cast %19 : vector<2xf32> to vector<2x1xf32>
    %cst_5 = arith.constant 5.000000e-01 : f32
    %21 = vector.broadcast %cst_5 : f32 to vector<2x1xf32>
    %22 = arith.cmpf ogt, %20, %21 : vector<2x1xf32>
    %23 = arith.extui %22 : vector<2x1xi1> to vector<2x1xi32>
    %24 = vector.shape_cast %23 : vector<2x1xi32> to vector<2x1xi32>
    %25 = vector.broadcast %24 : vector<2x1xi32> to vector<2x128xi32>
    %c0_6 = arith.constant 0 : index
    %c0_7 = arith.constant 0 : index
    %26 = vector.load %arg3[%c0_6, %c0_7] : memref<2x128xi32, #tpu.memory_space<vmem>>, vector<2x128xi32>
    tpu.vector_store %arg3[%c0_6, %c0_7], %25 {strides = array<i32>} : memref<2x128xi32, #tpu.memory_space<vmem>>, vector<2x128xi32>,
    return
  }
  func.func @transform_0(%arg0: i32, %arg1: memref<4xf32, #tpu.memory_space<smem>>) -> (i32, i32) {
    %c0_i32 = arith.constant 0 : i32
    %c0_i32_0 = arith.constant 0 : i32
    return %arg0, %c0_i32 : i32, i32
  }
  func.func @transform_1(%arg0: i32, %arg1: memref<4xf32, #tpu.memory_space<smem>>) -> (i32, i32) {
    %c0_i32 = arith.constant 0 : i32
    %c0_i32_0 = arith.constant 0 : i32
    return %arg0, %c0_i32 : i32, i32
  }
}

</mosaic_0001>

<bundles_post_ra>
// kernel: tpu_custom_call.1
= control target key start
LH: loop header
LB: loop body
LE: loop exit
PB: predicated region body
PF: predicated region fallthrough
CT: control target
= control target key end

     0   :  { %s156_s12 = smov [#allocation3]   ;;  %s184_s0 = inlined_call_operand.hbm [shape: f32[4], index: 0, kind: input, shape index: {}]   ;;  %s185_s1 = inlined_call_operand.hbm [shape: f32[2,1024], index: 1, kind: input, shape index: {}]   ;;  %s186_s2 = inlined_call_operand.hbm [shape: s32[2,128], index: 2, kind: output, shape index: {}]  }
   0x1   :  { %s8_s11 = sshll.u32 %s184_s0, 4  ;;  %s9_s11 = int_to_ptr.hbm [resolvable:$true] %s8_s11 }
   0x2   :  { %11 = dma.hbm_to_smem %s9_s11, 16, %s156_s12, [#allocation2] }
   0x3   :  { %150 = dma.done.wait [#allocation2], 16 }
   0x4   :  { %151 = vsyncadd [#allocation2], 4294967280 }
   0x5   :  { %14 = sfence }
   0x6   :  { %15 = vsyncpa [#allocation5], 0 }
   0x7   :  { %16 = vsyncpa [#allocation6], 0  ;;  %s22_s15 = sshll.u32 %s185_s1, 4  ;;  %s157_s16 = smov [#allocation4]   ;;  %s23_s15 = int_to_ptr.hbm [resolvable:$true] %s22_s15 }
   0x8   :  { %s24_s17 = sshll.u32 %s157_s16, 4  ;;  %s25_s17 = int_to_ptr.vmem [resolvable:$true] %s24_s17 }
   0x9   :  { %27 = dma.hbm_to_vmem [thread:$0]  %s23_s15, 256, %s25_s17, [#allocation5]  }
   0xa   :  { %152 = dma.done.wait [#allocation5], 256  }
   0xb   :  { %153 = vsyncadd [#allocation5], 4294967040  ;;  %s33_s0 = sld [smem:[#allocation3]]  ;;  %v32_v0 = vld [vmem:[#allocation4] sm:$0xf]  ;;  %vm57_vm0 = vcmask 1041408  }
   0xc   :  { %s83_s18 = sld [smem:[#allocation3 + $0x1]]  ;;  %v36_v2 = vld [vmem:[#allocation4 + $0x4] sm:$0xf]  ;;  %v41_v3 = vld [vmem:[#allocation4 + $0x8] sm:$0xf]  ;;  %s158_s1 = smov [#allocation7]  }
   0xd   :  { %s84_s19 = sld [smem:[#allocation3 + $0x2]]  ;;  %v46_v6 = vld [vmem:[#allocation4 + $0xc] sm:$0xf]  ;;  %s71_s21 = sshll.u32 %s158_s1, 4  ;;  %v159_v21 = vmov 0   ;;  %s72_s21 = int_to_ptr.vmem [resolvable:$true] %s71_s21 }
   0xe   :  { %s85_s20 = sld [smem:[#allocation3 + $0x3]]  ;;  %s73_s24 = sshll.u32 %s186_s2, 4  ;;  %s74_s24 = int_to_ptr.hbm [resolvable:$true] %s73_s24 }
  0x11   :  { %v34_v1 = vstv %s33_s0 }
  0x12   :  { %v35_v4 = vmul.f32 %v34_v1, %v32_v0  ;;  %v38_v5 = vstv %s83_s18 }
  0x13   :  { %v39_v7 = vmul.f32 %v38_v5, %v36_v2  ;;  %v43_v8 = vstv %s84_s19 }
  0x14   :  { %v44_v9 = vmul.f32 %v43_v8, %v41_v3  ;;  %v48_v10 = vstv %s85_s20 }
  0x15   :  { %v40_v11 = vadd.f32 %v39_v7, %v35_v4  ;;  %v49_v12 = vmul.f32 %v48_v10, %v46_v6 }
  0x17   :  { %v45_v13 = vadd.f32 %v44_v9, %v40_v11 }
  0x19   :  { %v50_v14 = vadd.f32 %v49_v12, %v45_v13 }
  0x1b   :  { %52 = vst [vmem:[#allocation1] ss:$4 sm:$0xff] %v50_v14 }
  0x22   :  { %v53_v15 = vld.sshfl [vmem:[#allocation1] sm:$0xff pattern:$0x73625140]  ;;  %v54_v16 = vld.sshfl [vmem:[#allocation1 + $0x8] sm:$0xff pattern:$0x73625140] }
  0x23   :  { %v58_v17 = vsel %vm57_vm0, %v53_v15, -inf  ;;  %v59_v18 = vsel %vm57_vm0, %v54_v16, -inf }
  0x24   :  { %v60_v19 = vmax.f32 %v58_v17, %v59_v18 }
  0x26   :  { %61 = vmax.xlane.f32.xlu0 %v60_v19 }
  0x99   :  { %v62_v20 = vpop.xlane.xlu0 %61 }
  0x9a   :  { %vm63_vm1 = vcmp.gt.f32.partialorder %v62_v20, 0.5 }
  0x9b   :  { %v64_v22 = vsel %vm63_vm1, 1, %v159_v21 }
  0x9c   :  { %65 = vst [vmem:[#allocation7] sm:$0x3] %v64_v22 }
  0x9d   :  { %76 = dma.vmem_to_hbm [thread:$0]  %s72_s21, 32, %s74_s24, [#allocation6]  }
  0x9e   :  { %154 = dma.done.wait [#allocation6], 32  }
  0x9f   :  { %155 = vsyncadd [#allocation6], 4294967264 }
  0xa0   :  { %81 = vsyncpa [#allocation5], 1 }
  0xa1   :  { %82 = vsyncpa [#allocation6], 1 }

</bundles_post_ra>
